<compile_context>
chip_gen: v7x
topology: tpu7x:2x2x1
jax: 0.10.0
libtpu: 0.0.40
codegen_flags: <defaults>
</compile_context>

<pallas_src>
import jax
import jax.numpy as jnp
from jax import lax
from jax.experimental import pallas as pl
from jax.experimental.pallas import tpu as pltpu


def _round_up(x, m):
    return ((x + m - 1) // m) * m


def _cdiv(a, b):
    return -(-a // b)


# --------------------------------------------------------------------------
# Batch-tiled MLP kernel: Linear/ReLU x2 -> Linear/tanh.
# BN is pre-folded into w1 / b1 by the wrapper, so the kernel body is pure
# MXU + bias/ReLU/tanh.  Weights arrive bf16; accumulation and elementwise
# math are f32.
# --------------------------------------------------------------------------
def actor_mlp_kernel(x_ref, w1_ref, b1_ref, w2_ref, b2_ref, wo_ref, bo_ref,
                     o_ref):
    h1 = jnp.dot(x_ref[...].astype(jnp.bfloat16), w1_ref[...],
                 preferred_element_type=jnp.float32) + b1_ref[...]
    h1 = jnp.maximum(h1, 0.0)

    h2 = jnp.dot(h1.astype(jnp.bfloat16), w2_ref[...],
                 preferred_element_type=jnp.float32) + b2_ref[...]
    h2 = jnp.maximum(h2, 0.0)

    out = jnp.dot(h2.astype(jnp.bfloat16), wo_ref[...],
                  preferred_element_type=jnp.float32) + bo_ref[...]
    o_ref[...] = jnp.tanh(out).astype(o_ref.dtype)


def _pick_tile(B, block_b):
    """Adaptive batch tile: big (amortize grid overhead), >=2 steps when
    possible (v7x megacore), never over-padding by more than 8 rows/step."""
    b8 = _round_up(B, 8)
    num_steps = _cdiv(b8, block_b)
    if b8 >= 16:
        num_steps = max(num_steps, 2)          # keep both v7x TCs busy
    tb = _round_up(_cdiv(b8, num_steps), 8)
    b_pad = tb * num_steps
    return tb, num_steps, b_pad


def _vmem_estimate(tb, S, H1, H2, A):
    x_bytes = 2 * tb * S * 4                       # double-buffered input tile
    out_bytes = 2 * tb * A * 4                     # double-buffered output
    w_bytes = 2 * 2 * (S * H1 + H1 * H2 + H2 * A)  # bf16 weights, 2 bufs
    b_bytes = 2 * 4 * (H1 + H2 + A)
    tmp_f32 = 4 * tb * (H1 + H2)                   # h1 / h2 temporaries
    tmp_bf16 = 2 * tb * (S + H1 + H2)              # bf16 casts of activations
    return x_bytes + out_bytes + w_bytes + b_bytes + tmp_f32 + tmp_bf16


def actor_forward(state, params, *, block_b=2048):
    """state: (B, state_size) or (state_size,) float32 -> (B, action_size)."""
    if state.ndim == 1:
        # mimic torch.unsqueeze(state, 0)
        # TODO(synk): training-mode BatchNorm with B=1 is degenerate (var=0);
        #             PyTorch raises here — an eval-mode/running-stats variant
        #             would be needed for single-state inference.
        state = state[None, :]
    state = state.astype(jnp.float32)
    B, S = state.shape
    H1 = params["w1"].shape[1]
    H2 = params["w2"].shape[1]
    A = params["wo"].shape[1]

    # ---- BatchNorm stats + fold (plain jnp; trivially fused by XLA) --------
    # x_hat = x*scale + shift, with scale = gamma*rsqrt(var+eps),
    #                               shift = beta - mean*scale.
    # relu(x_hat @ W1 + b1) == relu(x @ (diag(scale)@W1) + (shift@W1 + b1))
    # TODO(synk): for extremely large B, tile this reduction explicitly.
    mean = jnp.mean(state, axis=0, keepdims=True)                    # (1, S)
    var = jnp.mean(jnp.square(state - mean), axis=0, keepdims=True)  # biased
    scale = params["gamma"] * lax.rsqrt(var + 1e-5)                  # (1, S)
    shift = params["beta"] - mean * scale                            # (1, S)
    w1s = (scale.reshape(S, 1) * params["w1"]).astype(jnp.bfloat16)  # (S, H1)
    b1f = shift @ params["w1"] + params["b1"]                        # (1, H1)

    # bf16 weights: half the HBM->VMEM DMA bytes, native MXU dtype.
    w2_bf = params["w2"].astype(jnp.bfloat16)
    wo_bf = params["wo"].astype(jnp.bfloat16)

    # ---- Batch tiling -------------------------------------------------------
    tb, num_steps, b_pad = _pick_tile(B, block_b)
    x = state if b_pad == B else jnp.pad(state, ((0, b_pad - B), (0, 0)))

    flops = 2 * b_pad * (S * H1 + H1 * H2 + H2 * A)
    bytes_accessed = (x.size * 4 + b1f.size * 4
                      + w1s.size * 2 + w2_bf.size * 2 + wo_bf.size * 2
                      + params["b2"].size * 4 + params["bo"].size * 4
                      + b_pad * A * 4)

    vmem_limit = int(min(60 << 20,
                         max(32 << 20, 1.5 * _vmem_estimate(tb, S, H1, H2, A))))

    out = pl.pallas_call(
        actor_mlp_kernel,
        out_shape=jax.ShapeDtypeStruct((b_pad, A), jnp.float32),
        grid_spec=pltpu.PrefetchScalarGridSpec(
            num_scalar_prefetch=0,
            grid=(num_steps,),
            in_specs=[
                pl.BlockSpec((tb, S), lambda i: (i, 0)),     # x tile (f32)
                pl.BlockSpec((S, H1), lambda i: (0, 0)),     # W1 (BN-scaled, bf16)
                pl.BlockSpec((1, H1), lambda i: (0, 0)),     # folded b1 (f32)
                pl.BlockSpec((H1, H2), lambda i: (0, 0)),    # W2 (bf16)
                pl.BlockSpec((1, H2), lambda i: (0, 0)),     # b2 (f32)
                pl.BlockSpec((H2, A), lambda i: (0, 0)),     # Wo (bf16)
                pl.BlockSpec((1, A), lambda i: (0, 0)),      # bo (f32)
            ],
            out_specs=pl.BlockSpec((tb, A), lambda i: (i, 0)),
        ),
        compiler_params=pltpu.CompilerParams(
            dimension_semantics=("parallel",),
            vmem_limit_bytes=vmem_limit),
        cost_estimate=pl.CostEstimate(
            flops=flops,
            transcendentals=b_pad * A,          # tanh
            bytes_accessed=bytes_accessed),
    )(x, w1s, b1f, w2_bf, params["b2"], wo_bf, params["bo"])

    return out[:B]


def init_actor_params(key, state_size, fc_units, action_size):
    """Deterministic synthetic init (shapes match the torch module)."""
    dims = [state_size] + list(fc_units)
    keys = jax.random.split(key, 6)

    # weights stored as (in, out) == torch Linear weight transposed
    w1 = jax.random.uniform(keys[0], (dims[0], dims[1]), jnp.float32, -0.1, 0.1)
    b1 = jax.random.uniform(keys[1], (1, dims[1]), jnp.float32, -0.1, 0.1)
    w2 = jax.random.uniform(keys[2], (dims[1], dims[2]), jnp.float32, -0.1, 0.1)
    b2 = jax.random.uniform(keys[3], (1, dims[2]), jnp.float32, -0.1, 0.1)
    wo = jax.random.uniform(keys[4], (dims[2], action_size), jnp.float32, -0.003, 0.003)
    bo = jax.random.uniform(keys[5], (1, action_size), jnp.float32, -0.003, 0.003)

    # BatchNorm1d affine params: weight=1, bias=0 (PyTorch default init)
    gamma = jnp.ones((1, state_size), jnp.float32)
    beta = jnp.zeros((1, state_size), jnp.float32)

    return dict(gamma=gamma, beta=beta, w1=w1, b1=b1, w2=w2, b2=b2, wo=wo, bo=bo)


if __name__ == "__main__":
    key = jax.random.PRNGKey(0)
    k_state, k_params = jax.random.split(key)

    batch = 64                     # >=16 so the grid has 2 steps (v7x megacore)
    state_size = 16
    fc_units = [128, 128]          # module default: hardware-aligned widths
    action_size = 4

    state = jax.random.normal(k_state, (batch, state_size), jnp.float32)
    params = init_actor_params(k_params, state_size, fc_units, action_size)

    actor_fn = jax.jit(actor_forward)
    actions = actor_fn(state, params)
    jax.block_until_ready(actions)

    # Pure-JAX f32 reference (same math as the PyTorch module, outside Pallas).
    mean = jnp.mean(state, axis=0, keepdims=True)
    var = jnp.mean((state - mean) ** 2, axis=0, keepdims=True)
    xh = (state - mean) * lax.rsqrt(var + 1e-5) * params["gamma"] + params["beta"]
    h = jnp.maximum(xh @ params["w1"] + params["b1"], 0.0)
    h = jnp.maximum(h @ params["w2"] + params["b2"], 0.0)
    ref = jnp.tanh(h @ params["wo"] + params["bo"])

    assert actions.shape == (batch, action_size)
    # bf16 matmul operands (f32 accumulate) -> small numeric drift vs f32 ref.
    assert jnp.allclose(actions, ref, atol=5e-3, rtol=2e-2), "mismatch vs reference"

    print("KERNEL_OK")
</pallas_src>

<mosaic_0001>
module attributes {stable_mosaic.version = 11 : i64} {
  func.func @actor_mlp_kernel(%arg0: i32, %arg1: memref<32x16xf32, #tpu.memory_space<vmem>>, %arg2: memref<16x128xbf16, #tpu.memory_space<vmem>>, %arg3: memref<1x128xf32, #tpu.memory_space<vmem>>, %arg4: memref<128x128xbf16, #tpu.memory_space<vmem>>, %arg5: memref<1x128xf32, #tpu.memory_space<vmem>>, %arg6: memref<128x4xbf16, #tpu.memory_space<vmem>>, %arg7: memref<1x4xf32, #tpu.memory_space<vmem>>, %arg8: memref<32x4xf32, #tpu.memory_space<vmem>>) attributes {dimension_semantics = [#tpu.dimension_semantics<parallel>], iteration_bounds = array<i64: 2>, scalar_prefetch = 0 : i64, scratch_operands = 0 : i64, tpu.core_type = #tpu.core_type<tc>, window_params = [{transform_indices = @transform_0, window_bounds = array<i64: 32, 16>}, {pipeline_mode = #tpu.pipeline_mode<synchronous>, transform_indices = @transform_1, window_bounds = array<i64: 16, 128>}, {pipeline_mode = #tpu.pipeline_mode<synchronous>, transform_indices = @transform_2, window_bounds = array<i64: 1, 128>}, {pipeline_mode = #tpu.pipeline_mode<synchronous>, transform_indices = @transform_3, window_bounds = array<i64: 128, 128>}, {pipeline_mode = #tpu.pipeline_mode<synchronous>, transform_indices = @transform_4, window_bounds = array<i64: 1, 128>}, {pipeline_mode = #tpu.pipeline_mode<synchronous>, transform_indices = @transform_5, window_bounds = array<i64: 128, 4>}, {pipeline_mode = #tpu.pipeline_mode<synchronous>, transform_indices = @transform_6, window_bounds = array<i64: 1, 4>}, {transform_indices = @transform_7, window_bounds = array<i64: 32, 4>}]} {
    %c0 = arith.constant 0 : index
    %c0_0 = arith.constant 0 : index
    %0 = vector.load %arg1[%c0, %c0_0] : memref<32x16xf32, #tpu.memory_space<vmem>>, vector<32x16xf32>
    %1 = arith.truncf %0 : vector<32x16xf32> to vector<32x16xbf16>
    %c0_1 = arith.constant 0 : index
    %c0_2 = arith.constant 0 : index
    %2 = vector.load %arg2[%c0_1, %c0_2] : memref<16x128xbf16, #tpu.memory_space<vmem>>, vector<16x128xbf16>
    %cst = arith.constant dense<0.000000e+00> : vector<32x128xf32>
    %3 = tpu.matmul %1, %2, %cst {dimension_numbers = #tpu.dot_dimension_numbers<[1], [0], [0], [1], [0, 0, 1, 1], [], []>} : vector<32x16xbf16>, vector<16x128xbf16>, vector<32x128xf32> -> vector<32x128xf32>
    %c0_3 = arith.constant 0 : index
    %c0_4 = arith.constant 0 : index
    %4 = vector.load %arg3[%c0_3, %c0_4] : memref<1x128xf32, #tpu.memory_space<vmem>>, vector<1x128xf32>
    %5 = vector.broadcast %4 : vector<1x128xf32> to vector<32x128xf32>
    %6 = arith.addf %3, %5 : vector<32x128xf32>
    %cst_5 = arith.constant 0.000000e+00 : f32
    %7 = vector.broadcast %cst_5 : f32 to vector<32x128xf32>
    %8 = arith.maximumf %6, %7 : vector<32x128xf32>
    %9 = arith.truncf %8 : vector<32x128xf32> to vector<32x128xbf16>
    %c0_6 = arith.constant 0 : index
    %c0_7 = arith.constant 0 : index
    %10 = vector.load %arg4[%c0_6, %c0_7] : memref<128x128xbf16, #tpu.memory_space<vmem>>, vector<128x128xbf16>
    %cst_8 = arith.constant dense<0.000000e+00> : vector<32x128xf32>
    %11 = tpu.matmul %9, %10, %cst_8 {dimension_numbers = #tpu.dot_dimension_numbers<[1], [0], [0], [1], [0, 0, 1, 1], [], []>} : vector<32x128xbf16>, vector<128x128xbf16>, vector<32x128xf32> -> vector<32x128xf32>
    %c0_9 = arith.constant 0 : index
    %c0_10 = arith.constant 0 : index
    %12 = vector.load %arg5[%c0_9, %c0_10] : memref<1x128xf32, #tpu.memory_space<vmem>>, vector<1x128xf32>
    %13 = vector.broadcast %12 : vector<1x128xf32> to vector<32x128xf32>
    %14 = arith.addf %11, %13 : vector<32x128xf32>
    %cst_11 = arith.constant 0.000000e+00 : f32
    %15 = vector.broadcast %cst_11 : f32 to vector<32x128xf32>
    %16 = arith.maximumf %14, %15 : vector<32x128xf32>
    %17 = arith.truncf %16 : vector<32x128xf32> to vector<32x128xbf16>
    %c0_12 = arith.constant 0 : index
    %c0_13 = arith.constant 0 : index
    %18 = vector.load %arg6[%c0_12, %c0_13] : memref<128x4xbf16, #tpu.memory_space<vmem>>, vector<128x4xbf16>
    %cst_14 = arith.constant dense<0.000000e+00> : vector<32x4xf32>
    %19 = tpu.matmul %17, %18, %cst_14 {dimension_numbers = #tpu.dot_dimension_numbers<[1], [0], [0], [1], [0, 0, 1, 1], [], []>} : vector<32x128xbf16>, vector<128x4xbf16>, vector<32x4xf32> -> vector<32x4xf32>
    %c0_15 = arith.constant 0 : index
    %c0_16 = arith.constant 0 : index
    %20 = vector.load %arg7[%c0_15, %c0_16] : memref<1x4xf32, #tpu.memory_space<vmem>>, vector<1x4xf32>
    %21 = vector.broadcast %20 : vector<1x4xf32> to vector<32x4xf32>
    %22 = arith.addf %19, %21 : vector<32x4xf32>
    %23 = math.tanh %22 : vector<32x4xf32>
    %c0_17 = arith.constant 0 : index
    %c0_18 = arith.constant 0 : index
    %24 = vector.load %arg8[%c0_17, %c0_18] : memref<32x4xf32, #tpu.memory_space<vmem>>, vector<32x4xf32>
    tpu.vector_store %arg8[%c0_17, %c0_18], %23 {strides = array<i32>} : memref<32x4xf32, #tpu.memory_space<vmem>>, vector<32x4xf32>,
    return
  }
  func.func @transform_0(%arg0: i32) -> (i32, i32) {
    %c0_i32 = arith.constant 0 : i32
    %c0_i32_0 = arith.constant 0 : i32
    return %arg0, %c0_i32 : i32, i32
  }
  func.func @transform_1(%arg0: i32) -> (i32, i32) {
    %c0_i32 = arith.constant 0 : i32
    %c0_i32_0 = arith.constant 0 : i32
    %c0_i32_1 = arith.constant 0 : i32
    return %c0_i32, %c0_i32_0 : i32, i32
  }
  func.func @transform_2(%arg0: i32) -> (i32, i32) {
    %c0_i32 = arith.constant 0 : i32
    %c0_i32_0 = arith.constant 0 : i32
    %c0_i32_1 = arith.constant 0 : i32
    return %c0_i32, %c0_i32_0 : i32, i32
  }
  func.func @transform_3(%arg0: i32) -> (i32, i32) {
    %c0_i32 = arith.constant 0 : i32
    %c0_i32_0 = arith.constant 0 : i32
    %c0_i32_1 = arith.constant 0 : i32
    return %c0_i32, %c0_i32_0 : i32, i32
  }
  func.func @transform_4(%arg0: i32) -> (i32, i32) {
    %c0_i32 = arith.constant 0 : i32
    %c0_i32_0 = arith.constant 0 : i32
    %c0_i32_1 = arith.constant 0 : i32
    return %c0_i32, %c0_i32_0 : i32, i32
  }
  func.func @transform_5(%arg0: i32) -> (i32, i32) {
    %c0_i32 = arith.constant 0 : i32
    %c0_i32_0 = arith.constant 0 : i32
    %c0_i32_1 = arith.constant 0 : i32
    return %c0_i32, %c0_i32_0 : i32, i32
  }
  func.func @transform_6(%arg0: i32) -> (i32, i32) {
    %c0_i32 = arith.constant 0 : i32
    %c0_i32_0 = arith.constant 0 : i32
    %c0_i32_1 = arith.constant 0 : i32
    return %c0_i32, %c0_i32_0 : i32, i32
  }
  func.func @transform_7(%arg0: i32) -> (i32, i32) {
    %c0_i32 = arith.constant 0 : i32
    %c0_i32_0 = arith.constant 0 : i32
    return %arg0, %c0_i32 : i32, i32
  }
}

</mosaic_0001>

<bundles_post_ra>
// kernel: actor_forward.1
= control target key start
LH: loop header
LB: loop body
LE: loop exit
PB: predicated region body
PF: predicated region fallthrough
CT: control target
= control target key end

     0   :  { %s860_s24 = smov 0   ;;  %s944_s0 = inlined_call_operand.vmem [shape: f32[64,16], index: 0, kind: input, shape index: {}]   ;;  %s945_s1 = inlined_call_operand.vmem [shape: bf16[16,128], index: 1, kind: input, shape index: {}]   ;;  %s946_s2 = inlined_call_operand.vmem [shape: f32[1,128], index: 2, kind: input, shape index: {}]   ;;  %s947_s3 = inlined_call_operand.vmem [shape: bf16[128,128], index: 3, kind: input, shape index: {}]   ;;  %s948_s4 = inlined_call_operand.vmem [shape: f32[1,128], index: 4, kind: input, shape index: {}]   ;;  %s949_s5 = inlined_call_operand.vmem [shape: bf16[128,4], index: 5, kind: input, shape index: {}]   ;;  %s950_s6 = inlined_call_operand.vmem [shape: f32[1,4], index: 6, kind: input, shape index: {}]   ;;  %s951_s7 = inlined_call_operand.vmem [shape: f32[64,4], index: 7, kind: output, shape index: {}]  }
   0x1 LB: > { %s677_s25 = sadd.s32 4294967295, %s818_s24   ;;  %p681_p0 = scmp.ge.s32.totalorder %s818_s24, 1  ;;  %s818_s24 = sphi %s860_s24, %s17_s24  }
   0x2   : > { %p238_p1 = scmp.lt.s32.totalorder %s818_s24, 3 }
   0x4   : > { %p239_p2 = pnand %p681_p0, %p238_p1 }
   0x5   : > { %v787_v0 = vld [vmem:[%s945_s1] sm:$0xff] (!%p239_p2)   ;;  %s682_s28 = sshll.u32 (!%p239_p2), %s677_s25, 2  ;;  %v789_v2 = vld [vmem:[%s947_s3 + $0x8] sm:$0xff] (!%p239_p2)   ;;  %v790_v3 = vld [vmem:[%s947_s3 + $0x10] sm:$0xff] (!%p239_p2)   ;;  %vm304_vm0 = vcmask (!%p239_p2), 130048   ;;  %vm616_vm1 = vcmask (!%p239_p2), 31744  }
   0x6   : > { %242 = sbr.rel (%p239_p2) target bundleno = 695 (0x2b7), region = 48  ;;  %p271_p3 = scmp.lt.s32.totalorder (!%p239_p2), %s682_s28, 7  ;;  %733 = vmatprep.subr.bf16.mxu0 (!%p239_p2), %v787_v0  ;;  %v788_v1 = vld [vmem:[%s947_s3] sm:$0xff] (!%p239_p2)   ;;  %v791_v9 = vld [vmem:[%s947_s3 + $0x18] sm:$0xff] (!%p239_p2)   ;;  %v793_v12 = vld [vmem:[%s947_s3 + $0x28] sm:$0xff] (!%p239_p2)  }
   0x7   : > { %734 = vmatpush3.bf16.msra.mxu0 (!%p239_p2), %v787_v0  ;;  %739 = vmatprep.subr.bf16.mxu1 (!%p239_p2), %v788_v1  ;;  %v792_v11 = vld [vmem:[%s947_s3 + $0x20] sm:$0xff] (!%p239_p2)   ;;  %v794_v13 = vld [vmem:[%s947_s3 + $0x30] sm:$0xff] (!%p239_p2)   ;;  %v795_v14 = vld [vmem:[%s947_s3 + $0x38] sm:$0xff] (!%p239_p2)  }
   0x8   : > { %740 = vmatpush3.bf16.msra.mxu1 (!%p239_p2), %v788_v1  ;;  %v796_v15 = vld [vmem:[%s949_s5] sm:$0xff] (!%p239_p2)   ;;  %v797_v16 = vld [vmem:[%s949_s5 + $0x8] sm:$0xff] (!%p239_p2)   ;;  %v798_v17 = vld [vmem:[%s949_s5 + $0x10] sm:$0xff] (!%p239_p2)  }
   0x9   : > { %741 = vmatprep.subr.bf16.mxu1 (!%p239_p2), %v789_v2  ;;  %759 = vmatprep.subr.bf16.mxu0 (!%p239_p2), %v796_v15  ;;  %v799_v18 = vld [vmem:[%s949_s5 + $0x18] sm:$0xff] (!%p239_p2)   ;;  %v800_v19 = vld [vmem:[%s949_s5 + $0x20] sm:$0xff] (!%p239_p2)   ;;  %v801_v20 = vld [vmem:[%s949_s5 + $0x28] sm:$0xff] (!%p239_p2)  }
   0xa   : > { %v686_v21 = vld [vmem:[%s946_s2] ss:$0 sm:$0xff] (!%p239_p2)  ;;  %v802_v36 = vld [vmem:[%s949_s5 + $0x30] sm:$0xff] (!%p239_p2)   ;;  %v803_v37 = vld [vmem:[%s949_s5 + $0x38] sm:$0xff] (!%p239_p2)  }
   0xb   : > { %v690_v38 = vld [vmem:[%s948_s4] ss:$0 sm:$0xff] (!%p239_p2) }
   0xc   : > { %742 = vmatpush3.bf16.msra.mxu1 (!%p239_p2), %v789_v2  ;;  %v699_v53 = vld [vmem:[%s950_s6] ss:$0 sm:$0xff] (!%p239_p2) }
   0xd   : > { %s953_s28 = smov (!%p271_p3, %s682_s28), 7  ;;  %743 = vmatprep.subr.bf16.mxu1 %v790_v3 }
   0xe   : > { %s683_s10 = sshll.u32 %s953_s28, 3 }
   0xf   : > { %s274_s13 = scalar_lea.vmem %s944_s0, %s683_s10  ;;  %s280_s9 = scalar_lea.vmem %s951_s7, %s683_s10 }
  0x10   : > { %v283_v4 = vld [vmem:[%s274_s13] sm:$0xff]  ;;  %v284_v5 = vld [vmem:[%s274_s13 + $0x8] sm:$0xff]  ;;  %v285_v6 = vld [vmem:[%s274_s13 + $0x10] sm:$0xff]  ;;  %744 = vmatpush3.bf16.msra.mxu1 %v790_v3 }
  0x11   : > { %v287_v7 = vpack.c.bf16 %v284_v5, %v283_v4  ;;  %v286_v8 = vld [vmem:[%s274_s13 + $0x18] sm:$0xff]  ;;  %745 = vmatprep.subr.bf16.mxu1 %v791_v9 }
  0x12   : > { %v288_v10 = vpack.c.bf16 %v286_v8, %v285_v6 }
  0x13   : > { %735 = vmatprep.mubr.msk.bf16.mxu0 %vm304_vm0, %v287_v7 }
  0x14   : > { %736 = vmatmul.mubr.msk.bf16.vlgmr.msra.gmra.mrb[0].mxu0 %vm304_vm0, %v288_v10  ;;  %746 = vmatpush3.bf16.msra.mxu1 %v791_v9 }
  0x15   : > { %747 = vmatprep.subr.bf16.mxu1 %v792_v11  ;;  %760 = vmatpush3.bf16.msra.mxu0 %v796_v15 }
  0x16   : > { %761 = vmatprep.subr.bf16.mxu0 %v797_v16 }
  0x18   : > { %748 = vmatpush3.bf16.msra.mxu1 %v792_v11 }
  0x19   : > { %749 = vmatprep.subr.bf16.mxu1 %v793_v12  ;;  %762 = vmatpush3.bf16.msra.mxu0 %v797_v16 }
  0x1a   : > { %763 = vmatprep.subr.bf16.mxu0 %v798_v17 }
  0x1c   : > { %750 = vmatpush3.bf16.msra.mxu1 %v793_v12 }
  0x1d   : > { %751 = vmatprep.subr.bf16.mxu1 %v794_v13  ;;  %764 = vmatpush3.bf16.msra.mxu0 %v798_v17 }
  0x1e   : > { %765 = vmatprep.subr.bf16.mxu0 %v799_v18 }
  0x20   : > { %752 = vmatpush3.bf16.msra.mxu1 %v794_v13 }
  0x21   : > { %753 = vmatprep.subr.bf16.mxu1 %v795_v14  ;;  %766 = vmatpush3.bf16.msra.mxu0 %v799_v18 }
  0x22   : > { %767 = vmatprep.subr.bf16.mxu0 %v800_v19 }
  0x24   : > { %754 = vmatpush3.bf16.msra.mxu1 %v795_v14 }
  0x25   : > { %768 = vmatpush3.bf16.msra.mxu0 %v800_v19 }
  0x26   : > { %769 = vmatprep.subr.bf16.mxu0 %v801_v20 }
  0x29   : > { %770 = vmatpush3.bf16.msra.mxu0 %v801_v20 }
  0x2a   : > { %771 = vmatprep.subr.bf16.mxu0 %v802_v36 }
  0x2d   : > { %772 = vmatpush3.bf16.msra.mxu0 %v802_v36 }
  0x2e   : > { %773 = vmatprep.subr.bf16.mxu0 %v803_v37 }
  0x31   : > { %774 = vmatpush3.bf16.msra.mxu0 %v803_v37 }
  0xe7   : > { %v737_v22 = vpop.f32.mrb[0].mxu0 }
  0xe8   : > { %v354_v23 = vadd.f32 %v737_v22, %v686_v21  ;;  %v345_v24 = vpop.f32.mrb[1].mxu0 }
  0xe9   : > { %v346_v25 = vadd.f32 %v686_v21, %v345_v24  ;;  %v738_v26 = vpop.f32.mrb[2].mxu0 }
  0xea   : > { %v357_v27 = vadd.f32 %v738_v26, %v686_v21  ;;  %v348_v28 = vpop.f32.mrb[3].mxu0  ;;  %v362_v30 = vmax.f32 %v354_v23, 0.0 }
  0xeb   : > { %v349_v29 = vadd.f32 %v686_v21, %v348_v28  ;;  %v360_v32 = vmax.f32 %v346_v25, 0.0 }
  0xec   : > { %v363_v31 = vmax.f32 %v357_v27, 0.0 }
  0xed   : > { %v361_v33 = vmax.f32 %v349_v29, 0.0 }
  0xee   : > { %v365_v34 = vpack.c.bf16 %v363_v31, %v362_v30 }
  0xef   : > { %v364_v35 = vpack.c.bf16 %v361_v33, %v360_v32 }
  0xf1   : > { %755 = vmatprep.mubr.bf16.mxu1 %v364_v35 }
  0xf2   : > { %756 = vmatmul.mubr.bf16.vlgmr.msra.gmra.mrb[0].mxu1 %v365_v34 }
 0x1c5   : > { %v757_v39 = vpop.f32.mrb[0].mxu1 }
 0x1c6   : > { %v480_v40 = vadd.f32 %v757_v39, %v690_v38  ;;  %v471_v41 = vpop.f32.mrb[1].mxu1 }
 0x1c7   : > { %v472_v42 = vadd.f32 %v690_v38, %v471_v41  ;;  %v758_v43 = vpop.f32.mrb[2].mxu1 }
 0x1c8   : > { %v483_v44 = vadd.f32 %v758_v43, %v690_v38  ;;  %v474_v45 = vpop.f32.mrb[3].mxu1  ;;  %v488_v47 = vmax.f32 %v480_v40, 0.0 }
 0x1c9   : > { %v475_v46 = vadd.f32 %v690_v38, %v474_v45  ;;  %v486_v49 = vmax.f32 %v472_v42, 0.0 }
 0x1ca   : > { %v489_v48 = vmax.f32 %v483_v44, 0.0 }
 0x1cb   : > { %v487_v50 = vmax.f32 %v475_v46, 0.0 }
 0x1cc   : > { %v491_v51 = vpack.c.bf16 %v489_v48, %v488_v47 }
 0x1cd   : > { %v490_v52 = vpack.c.bf16 %v487_v50, %v486_v49 }
 0x1cf   : > { %775 = vmatprep.mubr.bf16.mxu0 %v490_v52 }
 0x1d0   : > { %776 = vmatmul.mubr.bf16.vlgmr.msra.gmra.mrb[4].mxu0 %v491_v51 }
 0x2a3   : > { %v777_v54 = vpop.f32.mrb[4].mxu0 }
 0x2a4   : > { %v597_v55 = vpop.f32.mrb[5].mxu0  ;;  %v606_v58 = vadd.f32 %v777_v54, %v699_v53 }
 0x2a5   : > { %v598_v56 = vadd.f32 %v699_v53, %v597_v55  ;;  %v778_v57 = vpop.f32.mrb[6].mxu0 }
 0x2a6   : > { %v600_v59 = vpop.f32.mrb[7].mxu0  ;;  %v609_v60 = vadd.f32 %v778_v57, %v699_v53 }
 0x2a7   : > { %804 = vtanh.f32 %v598_v56  ;;  %v601_v61 = vadd.f32 %v699_v53, %v600_v59 }
 0x2a9   : > { %806 = vtanh.f32 %v601_v61 }
 0x2aa   : > { %808 = vtanh.f32 %v606_v58 }
 0x2ab   : > { %810 = vtanh.f32 %v609_v60 }
 0x2b1   : > { %v805_v62 = vpop.eup %804 }
 0x2b2   : > { %617 = vst.msk [vmem:[%s280_s9] sm:$0xff] %vm616_vm1, %v805_v62 }
 0x2b3   : > { %v807_v63 = vpop.eup %806 }
 0x2b4   : > { %v809_v0 = vpop.eup %808  ;;  %618 = vst.msk [vmem:[%s280_s9 + $0x8] sm:$0xff] %vm616_vm1, %v807_v63 }
 0x2b5   : > { %v811_v1 = vpop.eup %810  ;;  %619 = vst.msk [vmem:[%s280_s9 + $0x10] sm:$0xff] %vm616_vm1, %v809_v0 }
 0x2b6   : > { %620 = vst.msk [vmem:[%s280_s9 + $0x18] sm:$0xff] %vm616_vm1, %v811_v1 }
 0x2b7 PF: > { %s17_s24 = sadd.s32 1, %s818_s24  }
 0x2b8   : > { %p14_p4 = scmp.ge.s32.totalorder %s17_s24, 4  }
 0x2ba   :  { %16 = sbr.rel (!%p14_p4) target bundleno = 1 (0x1), region = 78 }

</bundles_post_ra>
